<compile_context>
chip_gen: v6e
topology: v6e:2x2x1
jax: 0.10.0
libtpu: 0.0.40
codegen_flags: <defaults>
</compile_context>

<pallas_src>
import jax
import jax.numpy as jnp
from jax.experimental import pallas as pl
from jax.experimental.pallas import tpu as pltpu


def _round_up(x, m):
    return (x + m - 1) // m * m


def _mlp_kernel(x_ref, w1_ref, b1_ref, w2_ref, b2_ref, o_ref):
    # Fused: out = relu(x @ w1 + b1) @ w2 + b2
    # First matmul: bf16 operands, f32 accumulation on the MXU.
    h = jnp.dot(x_ref[...], w1_ref[...], preferred_element_type=jnp.float32)
    h = jnp.maximum(h + b1_ref[...], 0.0)          # bias + ReLU in f32 (VPU)
    # Second matmul is tiny (HID x O_pad); keep it f32 for accuracy.
    y = jnp.dot(h, w2_ref[...], preferred_element_type=jnp.float32)
    o_ref[...] = (y + b2_ref[...]).astype(o_ref.dtype)


def baseline_model_forward(x_nchw, w1, b1, w2, b2, *, tb_max=1024):
    """Equivalent of BaselineModel.forward(x) -> self.net(x) for
    net = Flatten -> Linear(D, HID) -> ReLU -> Linear(HID, OUT)."""
    B = x_nchw.shape[0]
    x2d = x_nchw.reshape(B, -1)                    # torch.flatten(x, 1) semantics
    D = x2d.shape[1]
    HID = w1.shape[1]
    OUT = w2.shape[1]

    # --- batch tiling: TB multiple of 16 (bf16 sublane packing), capped. -----
    TB = min(tb_max, _round_up(B, 16))
    B_pad = _round_up(B, TB)
    # --- lane-dense output: pad OUT up to a multiple of 128. -----------------
    O_pad = _round_up(OUT, 128)

    # bf16 for the dominant byte streams (x tile, w1); padding rows/cols are 0.
    x_p = jnp.zeros((B_pad, D), jnp.bfloat16).at[:B].set(x2d.astype(jnp.bfloat16))
    w1_b = w1.astype(jnp.bfloat16)
    b1_r = b1.reshape(1, HID).astype(jnp.float32)
    w2_p = jnp.zeros((HID, O_pad), jnp.float32).at[:, :OUT].set(
        w2.astype(jnp.float32))
    b2_p = jnp.zeros((1, O_pad), jnp.float32).at[:, :OUT].set(
        b2.reshape(1, OUT).astype(jnp.float32))

    grid = (B_pad // TB,)

    out_padded = pl.pallas_call(
        _mlp_kernel,
        out_shape=jax.ShapeDtypeStruct((B_pad, O_pad), jnp.float32),
        grid_spec=pltpu.PrefetchScalarGridSpec(
            num_scalar_prefetch=0,
            grid=grid,
            in_specs=[
                pl.BlockSpec((TB, D), lambda i: (i, 0)),      # x: batch-tiled
                pl.BlockSpec((D, HID), lambda i: (0, 0)),     # w1: VMEM-resident
                pl.BlockSpec((1, HID), lambda i: (0, 0)),     # b1: resident
                pl.BlockSpec((HID, O_pad), lambda i: (0, 0)), # w2: resident
                pl.BlockSpec((1, O_pad), lambda i: (0, 0)),   # b2: resident
            ],
            out_specs=pl.BlockSpec((TB, O_pad), lambda i: (i, 0)),
        ),
        compiler_params=pltpu.CompilerParams(
            dimension_semantics=("parallel",),   # shard batch tiles across TCs
        ),
    )(x_p, w1_b, b1_r, w2_p, b2_p)

    return out_padded[:B, :OUT]


if __name__ == "__main__":
    # Small shapes consistent with an image-classification `net`.
    B, C, Himg, Wimg = 2, 4, 16, 16
    D = C * Himg * Wimg          # 1024
    HID = 32
    OUT = 10

    key = jax.random.PRNGKey(0)
    kx, k1, k2, k3, k4 = jax.random.split(key, 5)

    x = jax.random.normal(kx, (B, C, Himg, Wimg), dtype=jnp.float32)
    w1 = jax.random.normal(k1, (D, HID), dtype=jnp.float32) * (1.0 / jnp.sqrt(D))
    b1 = jax.random.normal(k2, (1, HID), dtype=jnp.float32) * 0.01
    w2 = jax.random.normal(k3, (HID, OUT), dtype=jnp.float32) * (1.0 / jnp.sqrt(HID))
    b2 = jax.random.normal(k4, (1, OUT), dtype=jnp.float32) * 0.01

    out = baseline_model_forward(x, w1, b1, w2, b2)
    out = jax.block_until_ready(out)
    assert out.shape == (B, OUT)

    # Reference matching the kernel's numerics (bf16 first matmul, f32 accum).
    x2d = x.reshape(B, -1)
    h_ref = jnp.maximum(
        jnp.dot(x2d.astype(jnp.bfloat16), w1.astype(jnp.bfloat16),
                preferred_element_type=jnp.float32) + b1, 0.0)
    ref = h_ref @ w2 + b2
    assert jnp.allclose(out, ref, atol=1e-3, rtol=1e-3), (
        jnp.max(jnp.abs(out - ref)))

    print("KERNEL_OK")
</pallas_src>

<mosaic_0001>
module attributes {stable_mosaic.version = 11 : i64} {
  func.func @_mlp_kernel(%arg0: i32, %arg1: memref<16x1024xbf16, #tpu.memory_space<vmem>>, %arg2: memref<1024x32xbf16, #tpu.memory_space<vmem>>, %arg3: memref<1x32xf32, #tpu.memory_space<vmem>>, %arg4: memref<32x128xf32, #tpu.memory_space<vmem>>, %arg5: memref<1x128xf32, #tpu.memory_space<vmem>>, %arg6: memref<16x128xf32, #tpu.memory_space<vmem>>) attributes {dimension_semantics = [#tpu.dimension_semantics<parallel>], iteration_bounds = array<i64: 1>, scalar_prefetch = 0 : i64, scratch_operands = 0 : i64, tpu.core_type = #tpu.core_type<tc>, window_params = [{transform_indices = @transform_0, window_bounds = array<i64: 16, 1024>}, {pipeline_mode = #tpu.pipeline_mode<synchronous>, transform_indices = @transform_1, window_bounds = array<i64: 1024, 32>}, {pipeline_mode = #tpu.pipeline_mode<synchronous>, transform_indices = @transform_2, window_bounds = array<i64: 1, 32>}, {pipeline_mode = #tpu.pipeline_mode<synchronous>, transform_indices = @transform_3, window_bounds = array<i64: 32, 128>}, {pipeline_mode = #tpu.pipeline_mode<synchronous>, transform_indices = @transform_4, window_bounds = array<i64: 1, 128>}, {transform_indices = @transform_5, window_bounds = array<i64: 16, 128>}]} {
    %c0 = arith.constant 0 : index
    %c0_0 = arith.constant 0 : index
    %0 = vector.load %arg1[%c0, %c0_0] : memref<16x1024xbf16, #tpu.memory_space<vmem>>, vector<16x1024xbf16>
    %c0_1 = arith.constant 0 : index
    %c0_2 = arith.constant 0 : index
    %1 = vector.load %arg2[%c0_1, %c0_2] : memref<1024x32xbf16, #tpu.memory_space<vmem>>, vector<1024x32xbf16>
    %cst = arith.constant dense<0.000000e+00> : vector<16x32xf32>
    %2 = tpu.matmul %0, %1, %cst {dimension_numbers = #tpu.dot_dimension_numbers<[1], [0], [0], [1], [0, 0, 1, 1], [], []>} : vector<16x1024xbf16>, vector<1024x32xbf16>, vector<16x32xf32> -> vector<16x32xf32>
    %c0_3 = arith.constant 0 : index
    %c0_4 = arith.constant 0 : index
    %3 = vector.load %arg3[%c0_3, %c0_4] : memref<1x32xf32, #tpu.memory_space<vmem>>, vector<1x32xf32>
    %4 = vector.broadcast %3 : vector<1x32xf32> to vector<16x32xf32>
    %5 = arith.addf %2, %4 : vector<16x32xf32>
    %cst_5 = arith.constant 0.000000e+00 : f32
    %6 = vector.broadcast %cst_5 : f32 to vector<16x32xf32>
    %7 = arith.maximumf %5, %6 : vector<16x32xf32>
    %c0_6 = arith.constant 0 : index
    %c0_7 = arith.constant 0 : index
    %8 = vector.load %arg4[%c0_6, %c0_7] : memref<32x128xf32, #tpu.memory_space<vmem>>, vector<32x128xf32>
    %cst_8 = arith.constant dense<0.000000e+00> : vector<16x128xf32>
    %9 = tpu.matmul %7, %8, %cst_8 {dimension_numbers = #tpu.dot_dimension_numbers<[1], [0], [0], [1], [0, 0, 1, 1], [], []>} : vector<16x32xf32>, vector<32x128xf32>, vector<16x128xf32> -> vector<16x128xf32>
    %c0_9 = arith.constant 0 : index
    %c0_10 = arith.constant 0 : index
    %10 = vector.load %arg5[%c0_9, %c0_10] : memref<1x128xf32, #tpu.memory_space<vmem>>, vector<1x128xf32>
    %11 = vector.broadcast %10 : vector<1x128xf32> to vector<16x128xf32>
    %12 = arith.addf %9, %11 : vector<16x128xf32>
    %c0_11 = arith.constant 0 : index
    %c0_12 = arith.constant 0 : index
    %13 = vector.load %arg6[%c0_11, %c0_12] : memref<16x128xf32, #tpu.memory_space<vmem>>, vector<16x128xf32>
    tpu.vector_store %arg6[%c0_11, %c0_12], %12 {strides = array<i32>} : memref<16x128xf32, #tpu.memory_space<vmem>>, vector<16x128xf32>,
    return
  }
  func.func @transform_0(%arg0: i32) -> (i32, i32) {
    %c0_i32 = arith.constant 0 : i32
    %c0_i32_0 = arith.constant 0 : i32
    return %arg0, %c0_i32 : i32, i32
  }
  func.func @transform_1(%arg0: i32) -> (i32, i32) {
    %c0_i32 = arith.constant 0 : i32
    %c0_i32_0 = arith.constant 0 : i32
    %c0_i32_1 = arith.constant 0 : i32
    return %c0_i32, %c0_i32_0 : i32, i32
  }
  func.func @transform_2(%arg0: i32) -> (i32, i32) {
    %c0_i32 = arith.constant 0 : i32
    %c0_i32_0 = arith.constant 0 : i32
    %c0_i32_1 = arith.constant 0 : i32
    return %c0_i32, %c0_i32_0 : i32, i32
  }
  func.func @transform_3(%arg0: i32) -> (i32, i32) {
    %c0_i32 = arith.constant 0 : i32
    %c0_i32_0 = arith.constant 0 : i32
    %c0_i32_1 = arith.constant 0 : i32
    return %c0_i32, %c0_i32_0 : i32, i32
  }
  func.func @transform_4(%arg0: i32) -> (i32, i32) {
    %c0_i32 = arith.constant 0 : i32
    %c0_i32_0 = arith.constant 0 : i32
    %c0_i32_1 = arith.constant 0 : i32
    return %c0_i32, %c0_i32_0 : i32, i32
  }
  func.func @transform_5(%arg0: i32) -> (i32, i32) {
    %c0_i32 = arith.constant 0 : i32
    %c0_i32_0 = arith.constant 0 : i32
    return %arg0, %c0_i32 : i32, i32
  }
}

</mosaic_0001>

<bundles_post_ra>
// kernel: tpu_custom_call.1
= control target key start
LH: loop header
LB: loop body
LE: loop exit
PB: predicated region body
PF: predicated region fallthrough
CT: control target
= control target key end

     0   :  { %s1406_s0 = inlined_call_operand.vmem [shape: bf16[16,1024], index: 0, kind: input, shape index: {}]   ;;  %s1407_s1 = inlined_call_operand.vmem [shape: bf16[1024,32], index: 1, kind: input, shape index: {}]   ;;  %s1408_s2 = inlined_call_operand.vmem [shape: f32[1,32], index: 2, kind: input, shape index: {}]   ;;  %s1409_s3 = inlined_call_operand.vmem [shape: f32[32,128], index: 3, kind: input, shape index: {}]   ;;  %s1410_s4 = inlined_call_operand.vmem [shape: f32[1,128], index: 4, kind: input, shape index: {}]   ;;  %s1411_s5 = inlined_call_operand.hbm [shape: f32[16,128], index: 5, kind: output, shape index: {}]  }
   0x1   :  { %v1050_v0 = vld [vmem:[%s1407_s1 + $0x78] sm:$0xff]   ;;  %v1054_v4 = vld [vmem:[%s1407_s1 + $0x70] sm:$0xff]   ;;  %v1058_v8 = vld [vmem:[%s1407_s1 + $0x68] sm:$0xff]  }
   0x2   :  { %v1051_v1 = vld [vmem:[%s1407_s1 + $0xf8] sm:$0xff]   ;;  %942 = vmatprep.subr.bf16.mxu0 %v1050_v0  ;;  %v1055_v5 = vld [vmem:[%s1407_s1 + $0xf0] sm:$0xff]   ;;  %v1059_v9 = vld [vmem:[%s1407_s1 + $0xe8] sm:$0xff]  }
   0x3   :  { %v1052_v2 = vld [vmem:[%s1407_s1 + $0x38] sm:$0xff]   ;;  %964 = vmatprep.subr.bf16.mxu1 %v1051_v1  ;;  %v1056_v6 = vld [vmem:[%s1407_s1 + $0x30] sm:$0xff]   ;;  %v1060_v10 = vld [vmem:[%s1407_s1 + $0x28] sm:$0xff]  }
   0x4   :  { %v1053_v3 = vld [vmem:[%s1407_s1 + $0xb8] sm:$0xff]   ;;  %943 = vmatpush3.bf16.msra.mxu0 %v1052_v2  ;;  %v1057_v7 = vld [vmem:[%s1407_s1 + $0xb0] sm:$0xff]   ;;  %v1061_v11 = vld [vmem:[%s1407_s1 + $0xa8] sm:$0xff]  }
   0x5   :  { %965 = vmatpush3.bf16.msra.mxu1 %v1053_v3  ;;  %944 = vmatprep.subr.bf16.mxu0 %v1054_v4  ;;  %v1062_v12 = vld [vmem:[%s1407_s1 + $0x60] sm:$0xff]   ;;  %v1066_v16 = vld [vmem:[%s1407_s1 + $0x58] sm:$0xff]   ;;  %v1070_v20 = vld [vmem:[%s1407_s1 + $0x50] sm:$0xff]  }
   0x6   :  { %966 = vmatprep.subr.bf16.mxu1 %v1055_v5  ;;  %v1063_v13 = vld [vmem:[%s1407_s1 + $0xe0] sm:$0xff]   ;;  %v1067_v17 = vld [vmem:[%s1407_s1 + $0xd8] sm:$0xff]   ;;  %v1071_v21 = vld [vmem:[%s1407_s1 + $0xd0] sm:$0xff]  }
   0x7   :  { %v1064_v14 = vld [vmem:[%s1407_s1 + $0x20] sm:$0xff]   ;;  %v1068_v18 = vld [vmem:[%s1407_s1 + $0x18] sm:$0xff]   ;;  %v1072_v22 = vld [vmem:[%s1407_s1 + $0x10] sm:$0xff]  }
   0x8   :  { %945 = vmatpush3.bf16.msra.mxu0 %v1056_v6  ;;  %v1065_v15 = vld [vmem:[%s1407_s1 + $0xa0] sm:$0xff]   ;;  %v1069_v19 = vld [vmem:[%s1407_s1 + $0x98] sm:$0xff]   ;;  %v1073_v23 = vld [vmem:[%s1407_s1 + $0x90] sm:$0xff]  }
   0x9   :  { %967 = vmatpush3.bf16.msra.mxu1 %v1057_v7  ;;  %946 = vmatprep.subr.bf16.mxu0 %v1058_v8  ;;  %v1074_v24 = vld [vmem:[%s1407_s1 + $0x48] sm:$0xff]   ;;  %v1078_v28 = vld [vmem:[%s1407_s1 + $0x40] sm:$0xff]   ;;  %v1082_v40 = vld [vmem:[%s1407_s1 + $0x178] sm:$0xff]  }
   0xa   :  { %968 = vmatprep.subr.bf16.mxu1 %v1059_v9  ;;  %v1075_v25 = vld [vmem:[%s1407_s1 + $0xc8] sm:$0xff]   ;;  %v1079_v29 = vld [vmem:[%s1407_s1 + $0xc0] sm:$0xff]   ;;  %v1083_v41 = vld [vmem:[%s1407_s1 + $0x1f8] sm:$0xff]  }
   0xb   :  { %v1076_v26 = vld [vmem:[%s1407_s1 + $0x8] sm:$0xff]   ;;  %v1080_v30 = vld [vmem:[%s1407_s1] sm:$0xff]   ;;  %v1084_v42 = vld [vmem:[%s1407_s1 + $0x138] sm:$0xff]  }
   0xc   :  { %947 = vmatpush3.bf16.msra.mxu0 %v1060_v10  ;;  %v1077_v27 = vld [vmem:[%s1407_s1 + $0x88] sm:$0xff]   ;;  %v1081_v31 = vld [vmem:[%s1407_s1 + $0x80] sm:$0xff]   ;;  %v1085_v43 = vld [vmem:[%s1407_s1 + $0x1b8] sm:$0xff]  }
   0xd   :  { %969 = vmatpush3.bf16.msra.mxu1 %v1061_v11  ;;  %948 = vmatprep.subr.bf16.mxu0 %v1062_v12  ;;  %v22_v32 = vld [vmem:[%s1406_s0] sm:$0xff]  ;;  %v23_v34 = vld [vmem:[%s1406_s0 + $0x8] sm:$0xff]  ;;  %v1086_v44 = vld [vmem:[%s1407_s1 + $0x170] sm:$0xff]  }
   0xe   :  { %970 = vmatprep.subr.bf16.mxu1 %v1063_v13  ;;  %v26_v33 = vld [vmem:[%s1406_s0 + $0x20] sm:$0xff]  ;;  %v27_v37 = vld [vmem:[%s1406_s0 + $0x28] sm:$0xff]  ;;  %v1087_v45 = vld [vmem:[%s1407_s1 + $0x1f0] sm:$0xff]  }
   0xf   :  { %v867_v35 = vcombine.low %v22_v32, %v26_v33  ;;  %v868_v36 = vcombine.high %v22_v32, %v26_v33  ;;  %v869_v38 = vcombine.low %v23_v34, %v27_v37  ;;  %v870_v39 = vcombine.high %v23_v34, %v27_v37  ;;  %v1088_v46 = vld [vmem:[%s1407_s1 + $0x130] sm:$0xff]   ;;  %v1090_v48 = vld [vmem:[%s1407_s1 + $0x168] sm:$0xff]   ;;  %v1094_v52 = vld [vmem:[%s1407_s1 + $0x160] sm:$0xff]  }
  0x10   :  { %949 = vmatpush3.bf16.msra.mxu0 %v1064_v14  ;;  %v1089_v47 = vld [vmem:[%s1407_s1 + $0x1b0] sm:$0xff]   ;;  %v1091_v49 = vld [vmem:[%s1407_s1 + $0x1e8] sm:$0xff]   ;;  %v1095_v53 = vld [vmem:[%s1407_s1 + $0x1e0] sm:$0xff]  }
  0x11   :  { %971 = vmatpush3.bf16.msra.mxu1 %v1065_v15  ;;  %950 = vmatprep.subr.bf16.mxu0 %v1066_v16  ;;  %v1092_v50 = vld [vmem:[%s1407_s1 + $0x128] sm:$0xff]   ;;  %v1096_v54 = vld [vmem:[%s1407_s1 + $0x120] sm:$0xff]   ;;  %v1098_v56 = vld [vmem:[%s1407_s1 + $0x158] sm:$0xff]  }
  0x12   :  { %972 = vmatprep.subr.bf16.mxu1 %v1067_v17  ;;  %621 = vmatprep.mubr.bf16.mxu0 %v868_v36  ;;  %v1093_v51 = vld [vmem:[%s1407_s1 + $0x1a8] sm:$0xff]   ;;  %v1097_v55 = vld [vmem:[%s1407_s1 + $0x1a0] sm:$0xff]   ;;  %v1099_v57 = vld [vmem:[%s1407_s1 + $0x1d8] sm:$0xff]  }
  0x13   :  { %662 = vmatprep.mubr.bf16.mxu1 %v870_v39  ;;  %v1100_v58 = vld [vmem:[%s1407_s1 + $0x118] sm:$0xff]   ;;  %v1102_v60 = vld [vmem:[%s1407_s1 + $0x150] sm:$0xff]   ;;  %v1106_v0 = vld [vmem:[%s1407_s1 + $0x148] sm:$0xff]  }
  0x14   :  { %951 = vmatpush3.bf16.msra.mxu0 %v1068_v18  ;;  %v1101_v59 = vld [vmem:[%s1407_s1 + $0x198] sm:$0xff]   ;;  %v1103_v61 = vld [vmem:[%s1407_s1 + $0x1d0] sm:$0xff]   ;;  %v1107_v1 = vld [vmem:[%s1407_s1 + $0x1c8] sm:$0xff]  }
  0x15   :  { %973 = vmatpush3.bf16.msra.mxu1 %v1069_v19  ;;  %952 = vmatprep.subr.bf16.mxu0 %v1070_v20  ;;  %v1104_v62 = vld [vmem:[%s1407_s1 + $0x110] sm:$0xff]   ;;  %v1108_v2 = vld [vmem:[%s1407_s1 + $0x108] sm:$0xff]   ;;  %v1110_v4 = vld [vmem:[%s1407_s1 + $0x140] sm:$0xff]  }
  0x16   :  { %974 = vmatprep.subr.bf16.mxu1 %v1071_v21  ;;  %v1105_v63 = vld [vmem:[%s1407_s1 + $0x190] sm:$0xff]   ;;  %v1109_v3 = vld [vmem:[%s1407_s1 + $0x188] sm:$0xff]   ;;  %v1111_v5 = vld [vmem:[%s1407_s1 + $0x1c0] sm:$0xff]  }
  0x17   :  { %v1112_v6 = vld [vmem:[%s1407_s1 + $0x100] sm:$0xff]   ;;  %v24_v8 = vld [vmem:[%s1406_s0 + $0x10] sm:$0xff]  ;;  %v25_v12 = vld [vmem:[%s1406_s0 + $0x18] sm:$0xff] }
  0x18   :  { %953 = vmatpush3.bf16.msra.mxu0 %v1072_v22  ;;  %v1113_v7 = vld [vmem:[%s1407_s1 + $0x180] sm:$0xff]   ;;  %v28_v9 = vld [vmem:[%s1406_s0 + $0x30] sm:$0xff]  ;;  %v29_v13 = vld [vmem:[%s1406_s0 + $0x38] sm:$0xff] }
  0x19   :  { %975 = vmatpush3.bf16.msra.mxu1 %v1073_v23  ;;  %954 = vmatprep.subr.bf16.mxu0 %v1074_v24  ;;  %v871_v10 = vcombine.low %v24_v8, %v28_v9  ;;  %v872_v11 = vcombine.high %v24_v8, %v28_v9 }
  0x1a   :  { %976 = vmatprep.subr.bf16.mxu1 %v1075_v25 }
  0x1c   :  { %955 = vmatpush3.bf16.msra.mxu0 %v1076_v26 }
  0x1d   :  { %977 = vmatpush3.bf16.msra.mxu1 %v1077_v27  ;;  %956 = vmatprep.subr.bf16.mxu0 %v1078_v28 }
  0x1e   :  { %978 = vmatprep.subr.bf16.mxu1 %v1079_v29 }
  0x20   :  { %957 = vmatpush3.bf16.msra.mxu0 %v1080_v30 }
  0x21   :  { %979 = vmatpush3.bf16.msra.mxu1 %v1081_v31  ;;  %986 = vmatprep.subr.bf16.mxu0 %v1082_v40 }
  0x22   :  { %1008 = vmatprep.subr.bf16.mxu1 %v1083_v41 }
  0x23   :  { %622 = vmatmul.mubr.bf16.vlgmr.msra.gmra.mxu0 %v867_v35 }
  0x24   :  { %663 = vmatmul.mubr.bf16.vlgmr.msra.gmra.mxu1 %v869_v38  ;;  %987 = vmatpush3.bf16.msra.mxu0 %v1084_v42 }
  0x25   :  { %1009 = vmatpush3.bf16.msra.mxu1 %v1085_v43  ;;  %988 = vmatprep.subr.bf16.mxu0 %v1086_v44 }
  0x26   :  { %1010 = vmatprep.subr.bf16.mxu1 %v1087_v45 }
  0x28   :  { %989 = vmatpush3.bf16.msra.mxu0 %v1088_v46 }
  0x29   :  { %1011 = vmatpush3.bf16.msra.mxu1 %v1089_v47  ;;  %990 = vmatprep.subr.bf16.mxu0 %v1090_v48 }
  0x2a   :  { %1012 = vmatprep.subr.bf16.mxu1 %v1091_v49 }
  0x2c   :  { %991 = vmatpush3.bf16.msra.mxu0 %v1092_v50 }
  0x2d   :  { %1013 = vmatpush3.bf16.msra.mxu1 %v1093_v51  ;;  %992 = vmatprep.subr.bf16.mxu0 %v1094_v52 }
  0x2e   :  { %1014 = vmatprep.subr.bf16.mxu1 %v1095_v53 }
  0x30   :  { %993 = vmatpush3.bf16.msra.mxu0 %v1096_v54 }
  0x31   :  { %1015 = vmatpush3.bf16.msra.mxu1 %v1097_v55  ;;  %994 = vmatprep.subr.bf16.mxu0 %v1098_v56 }
  0x32   :  { %1016 = vmatprep.subr.bf16.mxu1 %v1099_v57 }
  0x34   :  { %995 = vmatpush3.bf16.msra.mxu0 %v1100_v58 }
  0x35   :  { %1017 = vmatpush3.bf16.msra.mxu1 %v1101_v59  ;;  %996 = vmatprep.subr.bf16.mxu0 %v1102_v60 }
  0x36   :  { %1018 = vmatprep.subr.bf16.mxu1 %v1103_v61 }
  0x38   :  { %997 = vmatpush3.bf16.msra.mxu0 %v1104_v62 }
  0x39   :  { %1019 = vmatpush3.bf16.msra.mxu1 %v1105_v63  ;;  %998 = vmatprep.subr.bf16.mxu0 %v1106_v0 }
  0x3a   :  { %1020 = vmatprep.subr.bf16.mxu1 %v1107_v1 }
  0x3c   :  { %999 = vmatpush3.bf16.msra.mxu0 %v1108_v2 }
  0x3d   :  { %1021 = vmatpush3.bf16.msra.mxu1 %v1109_v3  ;;  %1000 = vmatprep.subr.bf16.mxu0 %v1110_v4 }
  0x3e   :  { %1022 = vmatprep.subr.bf16.mxu1 %v1111_v5 }
  0x40   :  { %1001 = vmatpush3.bf16.msra.mxu0 %v1112_v6 }
  0x41   :  { %10 = vsyncpa [#allocation3], 0  ;;  %1023 = vmatpush3.bf16.msra.mxu1 %v1113_v7  ;;  %v873_v14 = vcombine.low %v25_v12, %v29_v13  ;;  %v874_v15 = vcombine.high %v25_v12, %v29_v13  ;;  %703 = vmatprep.mubr.bf16.mxu0 %v872_v11  ;;  %v758_v16 = vld [vmem:[%s1409_s3 + $0x18] sm:$0xff]  ;;  %v757_v17 = vld [vmem:[%s1409_s3 + $0x10] sm:$0xff]  ;;  %vm766_vm0 = vcmask 261120   ;;  %s1136_s20 = smov [#allocation2]  }
  0x42   :  { %1036 = vmatprep.subr.mxu0 %v758_v16  ;;  %v756_v18 = vld [vmem:[%s1409_s3 + $0x8] sm:$0xff]  ;;  %v755_v19 = vld [vmem:[%s1409_s3] sm:$0xff]  ;;  %s855_s21 = sshll.u32 %s1136_s20, 4  ;;  %s856_s21 = int_to_ptr.vmem [resolvable:$true] %s855_s21 }
  0x43   :  { %744 = vmatprep.mubr.bf16.mxu1 %v874_v15  ;;  %704 = vmatmul.mubr.bf16.vlgmr.msra.gmra.mxu0 %v871_v10  ;;  %v866_v27 = vld [vmem:[%s1408_s2] ss:$0 sm:$0xff]  ;;  %s1114_s22 = scalar_lea.vmem %s856_s21, 256  ;;  %p1119_p1 = scmp.lt.s32.totalorder %s856_s21, %s856_s21 }
  0x44   :  { %745 = vmatmul.mubr.bf16.vlgmr.msra.gmra.mxu1 %v873_v14  ;;  %1037 = vmatpush3.msra.mxu0 %v758_v16  ;;  %v939_v55 = vld [vmem:[%s1410_s4] ss:$0 sm:$0xff]  ;;  %p1115_p0 = scmp.ne.s32.totalorder %s856_s21, %s1114_s22  ;;  %p1120_p2 = scmp.lt.s32.totalorder %s1114_s22, %s1114_s22 }
  0x45   :  { %1038 = vmatprep.subr.mxu0 %v757_v17 }
  0x46   :  { %1039 = vmatpush3.msra.mxu0 %v757_v17  ;;  %p1121_p3 = por %p1120_p2, %p1119_p1 }
  0x47   :  { %1040 = vmatprep.subr.mxu0 %v756_v18 }
  0x48   :  { %1041 = vmatpush3.msra.mxu0 %v756_v18  ;;  %p1122_p4 = pnand %p1121_p3, %p1115_p0 }
  0x49   :  { %1042 = vmatprep.subr.mxu0 %v755_v19 }
  0x4a   :  { %1043 = vmatpush3.msra.mxu0 %v755_v19 }
  0xe3   :  { %v958_v20 = vpop.f32.mrf.mxu0 }
  0xe4   :  { %v980_v21 = vpop.f32.mrf.mxu1 }
  0xe5   :  { %v959_v22 = vpop.f32.mrf.mxu0 }
  0xe6   :  { %v981_v23 = vpop.f32.mrf.mxu1  ;;  %v960_v25 = vadd.f32 %v959_v22, %v958_v20 }
  0xe7   :  { %v961_v24 = vpop.f32.mrf.mxu0  ;;  %v982_v30 = vadd.f32 %v981_v23, %v980_v21 }
  0xe8   :  { %v983_v26 = vpop.f32.mrf.mxu1  ;;  %v624_v29 = vadd.f32 %v960_v25, %v866_v27 }
  0xe9   :  { %v962_v28 = vpop.f32.mrf.mxu0 }
  0xea   :  { %v963_v31 = vadd.f32 %v962_v28, %v961_v24  ;;  %v984_v32 = vpop.f32.mrf.mxu1  ;;  %v665_v36 = vadd.f32 %v982_v30, %v624_v29 }
  0xeb   :  { %v985_v41 = vadd.f32 %v984_v32, %v983_v26 }
  0xec   :  { %v627_v37 = vadd.f32 %v963_v31, %v866_v27 }
  0xee   :  { %v668_v46 = vadd.f32 %v985_v41, %v627_v37 }
 0x103   :  { %v1002_v33 = vpop.f32.mrf.mxu0 }
 0x104   :  { %v1024_v34 = vpop.f32.mrf.mxu1 }
 0x105   :  { %v1003_v35 = vpop.f32.mrf.mxu0 }
 0x106   :  { %v1004_v38 = vadd.f32 %v1003_v35, %v1002_v33  ;;  %v1025_v39 = vpop.f32.mrf.mxu1 }
 0x107   :  { %v1005_v40 = vpop.f32.mrf.mxu0  ;;  %v1026_v43 = vadd.f32 %v1025_v39, %v1024_v34 }
 0x108   :  { %v706_v42 = vadd.f32 %v1004_v38, %v665_v36  ;;  %v1027_v44 = vpop.f32.mrf.mxu1 }
 0x109   :  { %v1006_v45 = vpop.f32.mrf.mxu0 }
 0x10a   :  { %v747_v47 = vadd.f32 %v1026_v43, %v706_v42  ;;  %v1007_v48 = vadd.f32 %v1006_v45, %v1005_v40  ;;  %v1028_v49 = vpop.f32.mrf.mxu1 }
 0x10b   :  { %v1029_v52 = vadd.f32 %v1028_v49, %v1027_v44 }
 0x10c   :  { %v753_v50 = vmax.f32 %v747_v47, 0.0  ;;  %v709_v51 = vadd.f32 %v1007_v48, %v668_v46 }
 0x10e   :  { %v750_v53 = vadd.f32 %v1029_v52, %v709_v51  ;;  %1044 = vmatprep.mubr.msk.f32.mxu0 %vm766_vm0, %v753_v50 }
 0x110   :  { %v754_v54 = vmax.f32 %v750_v53, 0.0 }
 0x112   :  { %1045 = vmatmul.mubr.msk.f32.vlgmr.msra.gmra.mxu0 %vm766_vm0, %v754_v54 }
 0x1d2   :  { %v1046_v56 = vpop.f32.mrf.mxu0 }
 0x1d3   :  { %v845_v57 = vadd.f32 %v1046_v56, %v939_v55 }
 0x1d4   :  { %v839_v58 = vpop.f32.mrf.mxu0 }
 0x1d5   :  { %849 = vst [vmem:[#allocation2 + $0x8] sm:$0xff] %v845_v57  ;;  %v840_v59 = vadd.f32 %v939_v55, %v839_v58 }
 0x1d7   :  { %848 = vst [vmem:[#allocation2] sm:$0xff] %v840_v59 }
 0x1d8   :  { %1125 = shalt.err (!%p1122_p4)
}
 0x1d9   :  { %s1137_s23 = smov 128   ;;  %s1138_s24 = smov 8  }
 0x1da   :  { %861 = dma.vmem_to_hbm [thread:$0]  %s856_s21, 256, %s1411_s5, [#allocation3], %s1137_s23, %s1137_s23, %s1138_s24  }
 0x1db   :  { %1134 = dma.done.wait [#allocation3], 256  }
 0x1dc   :  { %1135 = vsyncadd [#allocation3], 4294967040 }
 0x1dd   :  { %865 = vsyncpa [#allocation3], 1 }

</bundles_post_ra>
